<compile_context>
chip_gen: v5e
topology: v5e:2x2
jax: 0.10.0
libtpu: 0.0.40
codegen_flags: <defaults>
</compile_context>

<pallas_src>
import jax
import jax.numpy as jnp
from jax.experimental import pallas as pl
from jax.experimental.pallas import tpu as pltpu

_INV_SQRT2 = 0.7071067811865476


def _gelu_exact(x):
    """Exact (erf-based) GELU, matching PyTorch nn.GELU() default.

    gelu(x) = 0.5*x*(1 + erf(x/sqrt2)) = 0.5*(x + |x|*erf(|x|/sqrt2))
    (x*erf(x/sqrt2) is even), so no sign select is needed.  erf on the
    non-negative argument uses Abramowitz & Stegun 7.1.26 (|err| <= 1.5e-7);
    its divide is an EUP approx reciprocal + one Newton step, and the exp is
    also an EUP op -- both off the VALU critical path.
    """
    ax = jnp.abs(x)
    z = ax * _INV_SQRT2
    d = 1.0 + 0.3275911 * z
    t = pl.reciprocal(d, approx=True)
    t = t * (2.0 - d * t)                              # one Newton refinement
    poly = t * (0.254829592 + t * (-0.284496736 + t * (1.421413741
              + t * (-1.453152027 + t * 1.061405429))))
    erf_abs = 1.0 - poly * jnp.exp(-(z * z))           # exp -> EUP slot
    return 0.5 * (x + ax * erf_abs)


def _token_mixer_kernel(x_ref, w1_ref, b1_ref, w2_ref, b2_ref, o_ref):
    # x_ref:  (L_in, Ct)  one batch element's input slab, channels on lanes
    # w1_ref: (H, L_in)   first Linear weight (PyTorch layout)
    # b1_ref: (H, 1)
    # w2_ref: (P, H)      second Linear weight
    # b2_ref: (P, 1)
    # o_ref:  (P, Ct)     lane-dense output block
    h = jnp.dot(w1_ref[...], x_ref[...], preferred_element_type=jnp.float32)
    h = _gelu_exact(h + b1_ref[...])                   # bias broadcast once/step
    # Dropout: identity in inference mode.
    y = jnp.dot(w2_ref[...], h, preferred_element_type=jnp.float32) + b2_ref[...]
    o_ref[...] = y.astype(o_ref.dtype)


def _choose_c_block(c_pad, seq_in, seq_out):
    """Largest 128-multiple divisor of c_pad within a per-step VMEM budget."""
    budget = 4 << 20                           # bytes for double-buffered in+out
    per_lane = 4 * 2 * (seq_in + seq_out)      # f32, x2 for double buffering
    cap = min(2048, max(128, (budget // per_lane) // 128 * 128))
    k = c_pad // 128
    best = 1
    for d in range(1, k + 1):
        if k % d == 0 and 128 * d <= cap:
            best = d
    return 128 * best


def token_mixer_forward(x, w1, b1, w2, b2, *, c_block=None):
    """TokenMixer forward (inference).

    x:  (B, input_seq, C) float32
    w1: (H, input_seq), b1: (H,)      -- nn.Linear(input_seq, H)
    w2: (P, H),         b2: (P,)      -- nn.Linear(H, P)
    returns (B, P, C), identical to
      transpose(1,2) -> Linear -> GELU -> Dropout(eval) -> Linear -> transpose(1,2).
    """
    B, L, C = x.shape
    H, L_w = w1.shape
    P, H_w = w2.shape
    assert L_w == L and H_w == H and b1.shape == (H,) and b2.shape == (P,)

    # Lane-dense channel tiling: pad C to a 128-multiple so every output store
    # is an unmasked vst, then pick the widest tile within a VMEM budget.
    c_pad = ((C + 127) // 128) * 128
    if c_block is None:
        c_block = _choose_c_block(c_pad, L, P)
        # v7x: make sure both TensorCores get work when B == 1.
        if B == 1 and c_pad // c_block == 1 and (c_pad // 128) % 2 == 0:
            c_block = c_pad // 2
    assert c_block % 128 == 0 and c_pad % c_block == 0

    xp = x if c_pad == C else jnp.pad(x, ((0, 0), (0, 0), (0, c_pad - C)))
    b1c = b1.reshape(H, 1).astype(jnp.float32)
    b2c = b2.reshape(P, 1).astype(jnp.float32)

    grid = (B, c_pad // c_block)

    out = pl.pallas_call(
        _token_mixer_kernel,
        out_shape=jax.ShapeDtypeStruct((B, P, c_pad), x.dtype),
        grid_spec=pltpu.PrefetchScalarGridSpec(
            num_scalar_prefetch=0,
            grid=grid,
            in_specs=[
                pl.BlockSpec((None, L, c_block), lambda b, j: (b, 0, j)),
                pl.BlockSpec((H, L), lambda b, j: (0, 0)),
                pl.BlockSpec((H, 1), lambda b, j: (0, 0)),
                pl.BlockSpec((P, H), lambda b, j: (0, 0)),
                pl.BlockSpec((P, 1), lambda b, j: (0, 0)),
            ],
            out_specs=pl.BlockSpec((None, P, c_block), lambda b, j: (b, 0, j)),
        ),
        compiler_params=pltpu.CompilerParams(
            dimension_semantics=("parallel", "parallel"),
            vmem_limit_bytes=32 * 1024 * 1024),
    )(xp, w1, b1c, w2, b2c)

    return out if c_pad == C else out[:, :, :C]


def _reference(x, w1, b1, w2, b2):
    # Pure-JAX mirror of the PyTorch module (eval mode).
    xt = jnp.swapaxes(x, 1, 2)                       # (B, C, L)
    h = xt @ w1.T + b1                               # (B, C, H)
    h = jax.nn.gelu(h, approximate=False)            # exact erf GELU
    y = h @ w2.T + b2                                # (B, C, P)
    return jnp.swapaxes(y, 1, 2)                     # (B, P, C)


if __name__ == "__main__":
    key = jax.random.PRNGKey(0)
    kx, kw1, kb1, kw2, kb2 = jax.random.split(key, 5)

    # Small shapes consistent with the module:
    #   batch=2, input_seq=16, channel/d_model=128, pred_seq=8, factor=4 (H=32)
    B, L_in, C = 2, 16, 128
    pred_seq, factor = 8, 4
    H = pred_seq * factor

    x  = jax.random.normal(kx,  (B, L_in, C),   dtype=jnp.float32)
    w1 = jax.random.normal(kw1, (H, L_in),      dtype=jnp.float32) * 0.1
    b1 = jax.random.normal(kb1, (H,),           dtype=jnp.float32) * 0.1
    w2 = jax.random.normal(kw2, (pred_seq, H),  dtype=jnp.float32) * 0.1
    b2 = jax.random.normal(kb2, (pred_seq,),    dtype=jnp.float32) * 0.1

    out = token_mixer_forward(x, w1, b1, w2, b2)
    out = jax.block_until_ready(out)

    ref = _reference(x, w1, b1, w2, b2)
    assert out.shape == ref.shape == (B, pred_seq, C), (out.shape, ref.shape)
    max_err = float(jnp.max(jnp.abs(out - ref)))
    # Small headroom over 1e-4 for the EUP approx-reciprocal seed (Newton-refined).
    assert jnp.allclose(out, ref, atol=2e-4, rtol=1e-4), max_err

    print("KERNEL_OK")
</pallas_src>

<mosaic_0001>
module attributes {stable_mosaic.version = 11 : i64} {
  func.func @_token_mixer_kernel(%arg0: i32, %arg1: i32, %arg2: memref<1x16x128xf32, #tpu.memory_space<vmem>>, %arg3: memref<32x16xf32, #tpu.memory_space<vmem>>, %arg4: memref<32x1xf32, #tpu.memory_space<vmem>>, %arg5: memref<8x32xf32, #tpu.memory_space<vmem>>, %arg6: memref<8x1xf32, #tpu.memory_space<vmem>>, %arg7: memref<1x8x128xf32, #tpu.memory_space<vmem>>) attributes {dimension_semantics = [#tpu.dimension_semantics<parallel>, #tpu.dimension_semantics<parallel>], iteration_bounds = array<i64: 2, 1>, scalar_prefetch = 0 : i64, scratch_operands = 0 : i64, tpu.core_type = #tpu.core_type<tc>, window_params = [{transform_indices = @transform_0, window_bounds = array<i64: 1, 16, 128>}, {pipeline_mode = #tpu.pipeline_mode<synchronous>, transform_indices = @transform_1, window_bounds = array<i64: 32, 16>}, {pipeline_mode = #tpu.pipeline_mode<synchronous>, transform_indices = @transform_2, window_bounds = array<i64: 32, 1>}, {pipeline_mode = #tpu.pipeline_mode<synchronous>, transform_indices = @transform_3, window_bounds = array<i64: 8, 32>}, {pipeline_mode = #tpu.pipeline_mode<synchronous>, transform_indices = @transform_4, window_bounds = array<i64: 8, 1>}, {transform_indices = @transform_5, window_bounds = array<i64: 1, 8, 128>}]} {
    %c0 = arith.constant 0 : index
    %c0_0 = arith.constant 0 : index
    %0 = vector.load %arg3[%c0, %c0_0] : memref<32x16xf32, #tpu.memory_space<vmem>>, vector<32x16xf32>
    %c0_1 = arith.constant 0 : index
    %c0_2 = arith.constant 0 : index
    %c0_3 = arith.constant 0 : index
    %1 = vector.load %arg2[%c0_1, %c0_2, %c0_3] : memref<1x16x128xf32, #tpu.memory_space<vmem>>, vector<1x16x128xf32>
    %2 = vector.shape_cast %1 : vector<1x16x128xf32> to vector<16x128xf32>
    %cst = arith.constant dense<0.000000e+00> : vector<32x128xf32>
    %3 = tpu.matmul %0, %2, %cst {dimension_numbers = #tpu.dot_dimension_numbers<[1], [0], [0], [1], [0, 0, 1, 1], [], []>} : vector<32x16xf32>, vector<16x128xf32>, vector<32x128xf32> -> vector<32x128xf32>
    %c0_4 = arith.constant 0 : index
    %c0_5 = arith.constant 0 : index
    %4 = vector.load %arg4[%c0_4, %c0_5] : memref<32x1xf32, #tpu.memory_space<vmem>>, vector<32x1xf32>
    %5 = vector.broadcast %4 : vector<32x1xf32> to vector<32x128xf32>
    %6 = arith.addf %3, %5 : vector<32x128xf32>
    %7 = math.absf %6 : vector<32x128xf32>
    %cst_6 = arith.constant 0.707106769 : f32
    %8 = vector.broadcast %cst_6 : f32 to vector<32x128xf32>
    %9 = arith.mulf %7, %8 : vector<32x128xf32>
    %cst_7 = arith.constant 0.327591091 : f32
    %10 = vector.broadcast %cst_7 : f32 to vector<32x128xf32>
    %11 = arith.mulf %10, %9 : vector<32x128xf32>
    %cst_8 = arith.constant 1.000000e+00 : f32
    %12 = vector.broadcast %cst_8 : f32 to vector<32x128xf32>
    %13 = arith.addf %12, %11 : vector<32x128xf32>
    %14 = tpu.reciprocal %13 {approx = true} : vector<32x128xf32> -> vector<32x128xf32>
    %15 = arith.mulf %13, %14 : vector<32x128xf32>
    %cst_9 = arith.constant 2.000000e+00 : f32
    %16 = vector.broadcast %cst_9 : f32 to vector<32x128xf32>
    %17 = arith.subf %16, %15 : vector<32x128xf32>
    %18 = arith.mulf %14, %17 : vector<32x128xf32>
    %cst_10 = arith.constant 1.06140542 : f32
    %19 = vector.broadcast %cst_10 : f32 to vector<32x128xf32>
    %20 = arith.mulf %18, %19 : vector<32x128xf32>
    %cst_11 = arith.constant -1.45315206 : f32
    %21 = vector.broadcast %cst_11 : f32 to vector<32x128xf32>
    %22 = arith.addf %21, %20 : vector<32x128xf32>
    %23 = arith.mulf %18, %22 : vector<32x128xf32>
    %cst_12 = arith.constant 1.42141378 : f32
    %24 = vector.broadcast %cst_12 : f32 to vector<32x128xf32>
    %25 = arith.addf %24, %23 : vector<32x128xf32>
    %26 = arith.mulf %18, %25 : vector<32x128xf32>
    %cst_13 = arith.constant -0.284496725 : f32
    %27 = vector.broadcast %cst_13 : f32 to vector<32x128xf32>
    %28 = arith.addf %27, %26 : vector<32x128xf32>
    %29 = arith.mulf %18, %28 : vector<32x128xf32>
    %cst_14 = arith.constant 0.254829586 : f32
    %30 = vector.broadcast %cst_14 : f32 to vector<32x128xf32>
    %31 = arith.addf %30, %29 : vector<32x128xf32>
    %32 = arith.mulf %18, %31 : vector<32x128xf32>
    %33 = arith.mulf %9, %9 : vector<32x128xf32>
    %cst_15 = arith.constant 0.000000e+00 : f32
    %34 = vector.broadcast %cst_15 : f32 to vector<32x128xf32>
    %35 = arith.subf %34, %33 : vector<32x128xf32>
    %36 = math.exp %35 : vector<32x128xf32>
    %37 = arith.mulf %32, %36 : vector<32x128xf32>
    %cst_16 = arith.constant 1.000000e+00 : f32
    %38 = vector.broadcast %cst_16 : f32 to vector<32x128xf32>
    %39 = arith.subf %38, %37 : vector<32x128xf32>
    %40 = arith.mulf %7, %39 : vector<32x128xf32>
    %41 = arith.addf %6, %40 : vector<32x128xf32>
    %cst_17 = arith.constant 5.000000e-01 : f32
    %42 = vector.broadcast %cst_17 : f32 to vector<32x128xf32>
    %43 = arith.mulf %42, %41 : vector<32x128xf32>
    %c0_18 = arith.constant 0 : index
    %c0_19 = arith.constant 0 : index
    %44 = vector.load %arg5[%c0_18, %c0_19] : memref<8x32xf32, #tpu.memory_space<vmem>>, vector<8x32xf32>
    %cst_20 = arith.constant dense<0.000000e+00> : vector<8x128xf32>
    %45 = tpu.matmul %44, %43, %cst_20 {dimension_numbers = #tpu.dot_dimension_numbers<[1], [0], [0], [1], [0, 0, 1, 1], [], []>} : vector<8x32xf32>, vector<32x128xf32>, vector<8x128xf32> -> vector<8x128xf32>
    %c0_21 = arith.constant 0 : index
    %c0_22 = arith.constant 0 : index
    %46 = vector.load %arg6[%c0_21, %c0_22] : memref<8x1xf32, #tpu.memory_space<vmem>>, vector<8x1xf32>
    %47 = vector.broadcast %46 : vector<8x1xf32> to vector<8x128xf32>
    %48 = arith.addf %45, %47 : vector<8x128xf32>
    %c0_23 = arith.constant 0 : index
    %c0_24 = arith.constant 0 : index
    %c0_25 = arith.constant 0 : index
    %49 = vector.load %arg7[%c0_23, %c0_24, %c0_25] : memref<1x8x128xf32, #tpu.memory_space<vmem>>, vector<1x8x128xf32>
    %50 = vector.shape_cast %49 : vector<1x8x128xf32> to vector<8x128xf32>
    %51 = vector.shape_cast %48 : vector<8x128xf32> to vector<1x8x128xf32>
    tpu.vector_store %arg7[%c0_23, %c0_24, %c0_25], %51 {strides = array<i32>} : memref<1x8x128xf32, #tpu.memory_space<vmem>>, vector<1x8x128xf32>,
    return
  }
  func.func @transform_0(%arg0: i32, %arg1: i32) -> (i32, i32, i32) {
    %c0_i32 = arith.constant 0 : i32
    %c0_i32_0 = arith.constant 0 : i32
    return %arg0, %c0_i32, %arg1 : i32, i32, i32
  }
  func.func @transform_1(%arg0: i32, %arg1: i32) -> (i32, i32) {
    %c0_i32 = arith.constant 0 : i32
    %c0_i32_0 = arith.constant 0 : i32
    %c0_i32_1 = arith.constant 0 : i32
    return %c0_i32, %c0_i32_0 : i32, i32
  }
  func.func @transform_2(%arg0: i32, %arg1: i32) -> (i32, i32) {
    %c0_i32 = arith.constant 0 : i32
    %c0_i32_0 = arith.constant 0 : i32
    %c0_i32_1 = arith.constant 0 : i32
    return %c0_i32, %c0_i32_0 : i32, i32
  }
  func.func @transform_3(%arg0: i32, %arg1: i32) -> (i32, i32) {
    %c0_i32 = arith.constant 0 : i32
    %c0_i32_0 = arith.constant 0 : i32
    %c0_i32_1 = arith.constant 0 : i32
    return %c0_i32, %c0_i32_0 : i32, i32
  }
  func.func @transform_4(%arg0: i32, %arg1: i32) -> (i32, i32) {
    %c0_i32 = arith.constant 0 : i32
    %c0_i32_0 = arith.constant 0 : i32
    %c0_i32_1 = arith.constant 0 : i32
    return %c0_i32, %c0_i32_0 : i32, i32
  }
  func.func @transform_5(%arg0: i32, %arg1: i32) -> (i32, i32, i32) {
    %c0_i32 = arith.constant 0 : i32
    %c0_i32_0 = arith.constant 0 : i32
    return %arg0, %c0_i32, %arg1 : i32, i32, i32
  }
}

</mosaic_0001>

<bundles_post_ra>
// kernel: tpu_custom_call.1
= control target key start
LH: loop header
LB: loop body
LE: loop exit
PB: predicated region body
PF: predicated region fallthrough
CT: control target
= control target key end

     0   :  { %10 = vsyncpa [#allocation3], 0  ;;  %s921_s0 = inlined_call_operand.vmem [shape: f32[2,16,128], index: 0, kind: input, shape index: {}]   ;;  %s922_s1 = inlined_call_operand.vmem [shape: f32[32,16], index: 1, kind: input, shape index: {}]   ;;  %s923_s2 = inlined_call_operand.vmem [shape: f32[32,1], index: 2, kind: input, shape index: {}]   ;;  %s924_s3 = inlined_call_operand.vmem [shape: f32[8,32], index: 3, kind: input, shape index: {}]   ;;  %s925_s4 = inlined_call_operand.vmem [shape: f32[8,1], index: 4, kind: input, shape index: {}]   ;;  %s926_s5 = inlined_call_operand.hbm [shape: f32[2,8,128], index: 5, kind: output, shape index: {}]  }
   0x1   :  { %12 = vsyncpa [#allocation3 + $0x1], 0  ;;  %s755_s18 = smov 0   ;;  %s757_s19 = smov 0  }
   0x2   :  { %s759_s20 = smov 0   ;;  %s761_s21 = smov 0  }
   0x3   :  { %s763_s22 = smov 0   ;;  %s765_s23 = smov 0  }
   0x4 LB: > { %s547_s24 = sadd.s32 4294967295, %s722_s23   ;;  %s548_s25 = sadd.s32 4294967294, %s722_s23   ;;  %s722_s23 = sphi %s765_s23, %s18_s23   ;;  %s718_s22 = sphi %s763_s22, %s933_s22   ;;  %s714_s21 = sphi %s761_s21, %s932_s21   ;;  %s710_s20 = sphi %s759_s20, %s931_s20   ;;  %s706_s19 = sphi %s757_s19, %s930_s19   ;;  %s702_s18 = sphi %s755_s18, %s929_s18  }
   0x5   : > { %s30_s26 = sadd.s32 1, %s718_s22  ;;  %s151_s27 = sadd.s32 1, %s710_s20 }
   0x6   : > { %p32_p0 = scmp.ge.s32.totalorder %s30_s26, 2  ;;  %p161_p1 = scmp.ne.s32.totalorder %s710_s20, %s706_s19 }
   0x7   : > { %p162_p2 = scmp.eq.s32.totalorder %s547_s24, 1  ;;  %p167_p3 = scmp.ne.s32.totalorder %s706_s19, %s702_s18 }
   0x8   : > { %s935_s26 = smov (%p32_p0, %s30_s26), 0  ;;  %p168_p5 = scmp.eq.s32.totalorder %s548_s25, 1 }
   0x9   : > { %p795_p4 = por %p162_p2, %p161_p1  ;;  %s146_s29 = ssub.s32 %s718_s22, %s935_s26 }
   0xa   : > { %p551_p6 = scmp.ge.s32.totalorder %s722_s23, 1  ;;  %p149_p7 = scmp.eq.s32.totalorder %s146_s29, 0 }
   0xb   : > { %p802_p8 = por %p168_p5, %p167_p3  ;;  %p209_p9 = scmp.lt.s32.totalorder %s722_s23, 3 }
   0xc   : > { %s808_s6 = scalar_select %p149_p7, %s710_s20, %s151_s27  }
   0xd   : > { %p210_p10 = pnand %p551_p6, %p209_p9 }
   0xe   : > { %p240_p11 = scmp.lt.s32.totalorder (!%p210_p10), %s714_s21, 1  ;;  %s237_s17 = sand.u32 (!%p210_p10), 1, %s706_s19  }
   0xf   : > { %213 = sbr.rel (%p210_p10) target bundleno = 356 (0x164), region = 40  ;;  %s552_s24 = sshll.u32 (!%p210_p10), %s237_s17, 3 }
  0x10   : > { %s561_s25 = sshll.u32 (!%p210_p10), %s714_s21, 3  ;;  %s239_s8 = scalar_lea.vmem (!%p210_p10), [#allocation2], %s552_s24 }
  0x11   : > { %s468_s7 = scalar_lea.hbm (!%p210_p10), %s926_s5, %s561_s25  ;;  %s470_s9 = sshll.u32 (!%p210_p10), %s239_s8, 4  ;;  %s471_s9 = int_to_ptr.vmem [resolvable:$true] %s470_s9 }
  0x12   : > { %s472_s10 = sshll.u32 (!%p210_p10), %s468_s7, 4  ;;  %s473_s10 = int_to_ptr.hbm [resolvable:$true] %s472_s10 }
  0x14   : > { %v724_v0 = vmov 0   ;;  %v255_v1 = vld [vmem:[%s923_s2 + $0x8] sm:$0xff]  ;;  %v257_v2 = vld [vmem:[%s923_s2 + $0x18] sm:$0xff]  ;;  %s241_s11 = scalar_select %p240_p11, %s714_s21, 1  ;;  %v248_v5 = vld [vmem:[%s922_s1] sm:$0xff]  ;;  %vm278_vm0 = vcmask 130048  }
  0x15   : > { %626 = vset.pattern.permute.xlu1 %v724_v0  ;;  %625 = vset.pattern.permute.xlu0 %v724_v0  ;;  %v249_v6 = vld [vmem:[%s922_s1 + $0x8] sm:$0xff]  ;;  %v251_v7 = vld [vmem:[%s922_s1 + $0x18] sm:$0xff]  ;;  %v254_v8 = vld [vmem:[%s923_s2] sm:$0xff]  ;;  %vm431_vm1 = vcmask 261120  }
  0x16   : > { %265 = vperm.xlu1 %626, %v255_v1   ;;  %275 = vperm.xlu0 %625, %v257_v2   ;;  %s564_s12 = sshll.u32 %s241_s11, 4  ;;  %v256_v9 = vld [vmem:[%s923_s2 + $0x10] sm:$0xff]  ;;  %s457_s11 = scalar_lea.sflag [#allocation3], %s237_s17 }
  0x17   : > { %627 = vset.pattern.permute.xlu2 %v724_v0  ;;  %s247_s15 = scalar_lea.vmem %s921_s0, %s564_s12  ;;  %v250_v10 = vld [vmem:[%s922_s1 + $0x10] sm:$0xff]  ;;  %s658_s12 = sshra.s32 %s473_s10, 4  ;;  %s659_s12 = int_to_ptr.hbm [resolvable:$true] %s658_s12 }
  0x18   : > { %v253_v3 = vld [vmem:[%s247_s15 + $0x8] sm:$0xff]  ;;  %v252_v4 = vld [vmem:[%s247_s15] sm:$0xff]  ;;  %s660_s13 = scalar_lea.hbm %s659_s12, 8  ;;  %s664_s15 = scalar_lea.hbm %s926_s5, 16 }
  0x19   : > { %305 = vmatpush.msra.mxu0 %v253_v3  ;;  %565 = vmatpush.msra.mxu2 %v253_v3  ;;  %p661_p12 = scmp.ne.s32.totalorder %s659_s12, %s660_s13  ;;  %p665_p1 = scmp.lt.s32.totalorder %s659_s12, %s926_s5 }
  0x1a   : > { %566 = vmatpush.msra.mxu3 %v253_v3  ;;  %p666_p2 = scmp.lt.s32.totalorder %s664_s15, %s660_s13 }
  0x1b   : > { %306 = vmatpush.msra.mxu0 %v252_v4  ;;  %567 = vmatpush.msra.mxu2 %v252_v4  ;;  %p662_p13 = pnand %p661_p12, %p795_p4 }
  0x1c   : > { %568 = vmatpush.msra.mxu3 %v252_v4  ;;  %555 = vmatmul.msk.f32.vlgmr.msra.gmra.mxu0 %vm278_vm0, %v248_v5  ;;  %p667_p3 = por %p666_p2, %p665_p1 }
  0x1d   : > { %556 = vmatmul.msk.f32.vlgmr.msra.gmra.mxu2 %vm278_vm0, %v249_v6  ;;  %558 = vmatmul.msk.f32.vlgmr.msra.gmra.mxu3 %vm278_vm0, %v251_v7  ;;  %p663_p0 = pneg %p662_p13 }
  0x1e   : > { %260 = vperm.xlu1 %626, %v254_v8   ;;  %270 = vperm.xlu0 %625, %v256_v9  }
  0x1f   : > { %p668_p5 = pnand %p667_p3, %p663_p0 }
  0x25   : > { %557 = vmatmul.msk.f32.gmra.mxu2 %vm278_vm0, %v250_v10 }
  0x88   : > { %v266_v11 = vpop.permute.xlu1 %265  ;;  %v276_v17 = vpop.permute.xlu0 %275 }
  0x90   : > { %v261_v12 = vpop.permute.xlu1 %260  ;;  %v271_v31 = vpop.permute.xlu0 %270 }
  0x99   : > { %v308_v13 = vpop.f32.mrf.mxu0 }
  0x9a   : > { %v839_v14 = vadd.f32 %v308_v13, %v261_v12 }
  0x9c   : > { %v320_v15 = vand.u32 2147483647, %v839_v14 }
  0x9e   : > { %v324_v16 = vmul.f32 0.70710677, %v320_v15 }
  0xa0   : > { %v328_v18 = vmul.f32 0.3275911, %v324_v16  ;;  %v311_v19 = vpop.f32.mrf.mxu2  ;;  %v317_v20 = vpop.f32.mrf.mxu3  ;;  %v388_v0 = vmul.f32 %v324_v16, %v324_v16  ;;  %v425_v16 = vld [vmem:[%s925_s4] sm:$0xff] }
  0xa1   : > { %v844_v21 = vadd.f32 %v311_v19, %v266_v11  ;;  %v846_v22 = vadd.f32 %v317_v20, %v276_v17  ;;  %428 = vperm.xlu2 %627, %v425_v16  }
  0xa2   : > { %v332_v23 = vadd.f32 1.0, %v328_v18  ;;  %v392_v10 = vsub.f32 0.0, %v388_v0 }
  0xa3   : > { %v321_v24 = vand.u32 2147483647, %v844_v21  ;;  %v323_v25 = vand.u32 2147483647, %v846_v22 }
  0xa4   : > { %628 = vrcp.f32 %v332_v23 }
  0xa5   : > { %v325_v26 = vmul.f32 0.70710677, %v321_v24  ;;  %v327_v27 = vmul.f32 0.70710677, %v323_v25 }
  0xa7   : > { %v329_v28 = vmul.f32 0.3275911, %v325_v26  ;;  %v331_v29 = vmul.f32 0.3275911, %v327_v27  ;;  %v391_v55 = vmul.f32 %v327_v27, %v327_v27  ;;  %v389_v59 = vmul.f32 %v325_v26, %v325_v26 }
  0xa8   : > { %v314_v30 = vpop.f32.mrf.mxu2 }
  0xa9   : > { %v333_v32 = vadd.f32 1.0, %v329_v28  ;;  %v335_v33 = vadd.f32 1.0, %v331_v29  ;;  %v854_v35 = vadd.f32 %v314_v30, %v271_v31  ;;  %v395_v1 = vsub.f32 0.0, %v391_v55 }
  0xaa   : > { %v629_v34 = vpop.eup %628  ;;  %v393_v5 = vsub.f32 0.0, %v389_v59  ;;  %v396_v28 = vmul.f32 1.442695, %v392_v10 }
  0xab   : > { %v340_v36 = vmul.f32 %v629_v34, %v332_v23  ;;  %630 = vrcp.f32 %v333_v32  ;;  %v322_v37 = vand.u32 2147483647, %v854_v35  ;;  %v402_v11 = vmul.f32 1.442695, %v395_v1 }
  0xac   : > { %632 = vrcp.f32 %v335_v33  ;;  %v398_v19 = vmul.f32 1.442695, %v393_v5 }
  0xad   : > { %v344_v38 = vsub.f32 2.0, %v340_v36  ;;  %v326_v39 = vmul.f32 0.70710677, %v322_v37 }
  0xaf   : > { %v859_v40 = vmul.f32 %v629_v34, %v344_v38  ;;  %v330_v41 = vmul.f32 0.3275911, %v326_v39  ;;  %v390_v12 = vmul.f32 %v326_v39, %v326_v39 }
  0xb1   : > { %v631_v42 = vpop.eup %630  ;;  %v352_v43 = vmul.f32 1.0614054, %v859_v40  ;;  %v334_v46 = vadd.f32 1.0, %v330_v41  ;;  %v394_v29 = vsub.f32 0.0, %v390_v12 }
  0xb2   : > { %v633_v44 = vpop.eup %632  ;;  %v341_v45 = vmul.f32 %v631_v42, %v333_v32 }
  0xb3   : > { %v343_v47 = vmul.f32 %v633_v44, %v335_v33  ;;  %v356_v48 = vadd.f32 -1.4531521, %v352_v43  ;;  %634 = vrcp.f32 %v334_v46  ;;  %v400_v39 = vmul.f32 1.442695, %v394_v29 }
  0xb4   : > { %v345_v49 = vsub.f32 2.0, %v341_v45  ;;  %636 = vpow2.f32 %v402_v11 }
  0xb5   : > { %v347_v50 = vsub.f32 2.0, %v343_v47  ;;  %v360_v51 = vmul.f32 %v356_v48, %v859_v40  ;;  %638 = vpow2.f32 %v398_v19 }
  0xb6   : > { %v349_v52 = vmul.f32 %v631_v42, %v345_v49  ;;  %640 = vpow2.f32 %v396_v28 }
  0xb7   : > { %v351_v53 = vmul.f32 %v633_v44, %v347_v50  ;;  %v364_v54 = vadd.f32 1.4214138, %v360_v51  ;;  %642 = vpow2.f32 %v400_v39 }
  0xb8   : > { %v353_v56 = vmul.f32 1.0614054, %v349_v52 }
  0xb9   : > { %v355_v57 = vmul.f32 1.0614054, %v351_v53  ;;  %v635_v58 = vpop.eup %634  ;;  %v368_v63 = vmul.f32 %v364_v54, %v859_v40 }
  0xba   : > { %v357_v60 = vadd.f32 -1.4531521, %v353_v56  ;;  %v342_v61 = vmul.f32 %v635_v58, %v334_v46  ;;  %v637_v44 = vpop.eup %636 }
  0xbb   : > { %v359_v62 = vadd.f32 -1.4531521, %v355_v57  ;;  %v372_v9 = vadd.f32 -0.28449672, %v368_v63  ;;  %v639_v48 = vpop.eup %638 }
  0xbc   : > { %v361_v2 = vmul.f32 %v357_v60, %v349_v52  ;;  %v346_v3 = vsub.f32 2.0, %v342_v61  ;;  %v641_v54 = vpop.eup %640 }
  0xbd   : > { %v363_v4 = vmul.f32 %v359_v62, %v351_v53  ;;  %v376_v27 = vmul.f32 %v372_v9, %v859_v40  ;;  %v643_v59 = vpop.eup %642 }
  0xbe   : > { %v365_v6 = vadd.f32 1.4214138, %v361_v2  ;;  %v350_v7 = vmul.f32 %v635_v58, %v346_v3 }
  0xbf   : > { %v367_v8 = vadd.f32 1.4214138, %v363_v4  ;;  %v380_v38 = vadd.f32 0.2548296, %v376_v27 }
  0xc0   : > { %v369_v13 = vmul.f32 %v365_v6, %v349_v52  ;;  %v354_v18 = vmul.f32 1.0614054, %v350_v7 }
  0xc1   : > { %v371_v17 = vmul.f32 %v367_v8, %v351_v53  ;;  %v384_v47 = vmul.f32 %v380_v38, %v859_v40 }
  0xc2   : > { %v373_v20 = vadd.f32 -0.28449672, %v369_v13  ;;  %v358_v26 = vadd.f32 -1.4531521, %v354_v18 }
  0xc3   : > { %v375_v23 = vadd.f32 -0.28449672, %v371_v17  ;;  %v404_v57 = vmul.f32 %v641_v54, %v384_v47 }
  0xc4   : > { %v377_v30 = vmul.f32 %v373_v20, %v349_v52  ;;  %v362_v32 = vmul.f32 %v358_v26, %v350_v7 }
  0xc5   : > { %v379_v31 = vmul.f32 %v375_v23, %v351_v53  ;;  %v408_v62 = vsub.f32 1.0, %v404_v57 }
  0xc6   : > { %v381_v33 = vadd.f32 0.2548296, %v377_v30  ;;  %v366_v36 = vadd.f32 1.4214138, %v362_v32 }
  0xc7   : > { %v383_v34 = vadd.f32 0.2548296, %v379_v31 }
  0xc8   : > { %v370_v42 = vmul.f32 %v366_v36, %v350_v7  ;;  %v385_v43 = vmul.f32 %v381_v33, %v349_v52 }
  0xc9   : > { %v387_v41 = vmul.f32 %v383_v34, %v351_v53 }
  0xca   : > { %v374_v46 = vadd.f32 -0.28449672, %v370_v42  ;;  %v405_v51 = vmul.f32 %v639_v48, %v385_v43 }
  0xcb   : > { %v407_v45 = vmul.f32 %v637_v44, %v387_v41 }
  0xcc   : > { %v378_v50 = vmul.f32 %v374_v46, %v350_v7  ;;  %v409_v52 = vsub.f32 1.0, %v405_v51 }
  0xcd   : > { %v411_v49 = vsub.f32 1.0, %v407_v45 }
  0xce   : > { %v382_v56 = vadd.f32 0.2548296, %v378_v50  ;;  %v413_v63 = vmul.f32 %v409_v52, %v321_v24  ;;  %v424_v24 = vld [vmem:[%s924_s3] sm:$0xff] }
  0xcf   : > { %v415_v55 = vmul.f32 %v411_v49, %v323_v25  ;;  %v412_v25 = vmul.f32 %v408_v62, %v320_v15 }
  0xd0   : > { %v386_v58 = vmul.f32 %v382_v56, %v350_v7  ;;  %v417_v1 = vadd.f32 %v413_v63, %v844_v21 }
  0xd1   : > { %v419_v53 = vadd.f32 %v415_v55, %v846_v22  ;;  %v416_v3 = vadd.f32 %v412_v25, %v839_v14 }
  0xd2   : > { %v406_v61 = vmul.f32 %v643_v59, %v386_v58  ;;  %v421_v4 = vmul.f32 0.5, %v417_v1 }
  0xd3   : > { %v423_v60 = vmul.f32 0.5, %v419_v53  ;;  %v420_v5 = vmul.f32 0.5, %v416_v3 }
  0xd4   : > { %v410_v40 = vsub.f32 1.0, %v406_v61 }
  0xd5   : > { %447 = vmatpush.msra.mxu1 %v423_v60 }
  0xd6   : > { %v414_v0 = vmul.f32 %v410_v40, %v322_v37 }
  0xd8   : > { %v418_v22 = vadd.f32 %v414_v0, %v854_v35 }
  0xda   : > { %v422_v2 = vmul.f32 0.5, %v418_v22 }
  0xdc   : > { %448 = vmatpush.msra.mxu1 %v422_v2 }
  0xde   : > { %449 = vmatpush.msra.mxu1 %v421_v4 }
  0xe0   : > { %450 = vmatpush.msra.mxu1 %v420_v5 }
  0xe1   : > { %559 = vmatmul.msk.f32.vlgmr.msra.gmra.mxu1 %vm431_vm1, %v424_v24 }
  0xfb   : > { %v429_v14 = vpop.permute.xlu2 %428 }
 0x15e   : > { %v452_v15 = vpop.f32.mrf.mxu1 }
 0x15f   : > { %v453_v21 = vadd.f32 %v452_v15, %v429_v14 }
 0x161   : > { %455 = vst [vmem:[%s239_s8] sm:$0xff] %v453_v21 }
 0x162   : > { %671 = shalt.err (!%p668_p5)
}
 0x163   : > { %569 = dma.vmem_to_hbm [thread:$0]  (%p795_p4), %s471_s9, 128, %s473_s10, %s457_s11  }
 0x164 PF: > { %p575_p6 = scmp.ge.s32.totalorder %s722_s23, 2  ;;  %s484_s17 = sand.u32 1, %s702_s18  }
 0x165   : > { %s485_s25 = scalar_lea.sflag [#allocation3], %s484_s17 }
 0x166   : > { %p572_p7 = pnand %p575_p6, %p802_p8 }
 0x168   : > { %p573_p9 = pneg %p572_p7 }
 0x16a   : > { %697 = dma.done.wait (%p573_p9), %s485_s25, 128  }
 0x16b   : > { %699 = vsyncadd (%p573_p9), %s485_s25, 4294967168  ;;  %s18_s23 = sadd.s32 1, %s722_s23   ;;  %s929_s18 = smov %s706_s19 }
 0x16c   : > { %p15_p10 = scmp.ge.s32.totalorder %s18_s23, 4   ;;  %s930_s19 = smov %s710_s20 }
 0x16d   : > { %s931_s20 = smov %s808_s6  ;;  %s932_s21 = smov %s718_s22 }
 0x16e   : > { %s933_s22 = smov %s935_s26  ;;  %17 = sbr.rel (!%p15_p10) target bundleno = 4 (0x4), region = 75 }
 0x173   :  { %491 = vsyncpa [#allocation3], 1 }
 0x174   :  { %493 = vsyncpa [#allocation3 + $0x1], 1 }

</bundles_post_ra>
